<compile_context>
chip_gen: v7x
topology: tpu7x:2x2x1
jax: 0.10.0
libtpu: 0.0.40
codegen_flags: <defaults>
</compile_context>

<pallas_src>
import functools

import jax
import jax.numpy as jnp
from jax import lax
from jax.experimental import pallas as pl
from jax.experimental.pallas import tpu as pltpu

_F32 = 4  # bytes per float32


def _vmem_capacity_bytes():
    """Physical VMEM per TensorCore; conservative (v7x-sized) default if unknown."""
    try:
        cap = getattr(pltpu.get_tpu_info(), "vmem_capacity_bytes", None)
        if cap:
            return int(cap)
    except Exception:
        pass
    return 64 << 20


def _largest_divisor_leq(n, cap):
    cap = max(1, min(int(n), int(cap)))
    for d in range(cap, 0, -1):
        if n % d == 0:
            return d
    return 1


# ---------------------------------------------------------------------------
# Fast path: one grid step handles Bt batches, full (Bt, C, HW) slab in VMEM.
# ---------------------------------------------------------------------------
def _fused_kernel(x_ref, w1_ref, b1_ref, w2_ref, b2_ref, o_ref, *, inv_hw):
    x_blk = x_ref[...]                                     # (Bt, C, HW) f32
    # Global average pool: lane-axis reduce (Mosaic masks the physical lane
    # padding when HW is not a multiple of 128) scaled by a static 1/HW.
    gap = jnp.sum(x_blk, axis=-1) * inv_hw                 # (Bt, C)
    h = jnp.dot(gap, w1_ref[...], preferred_element_type=jnp.float32) + b1_ref[...]
    h = jnp.maximum(h, 0.0)
    a = jnp.dot(h, w2_ref[...], preferred_element_type=jnp.float32) + b2_ref[...]
    att = jax.nn.sigmoid(a)                                # (Bt, C)
    o_ref[...] = x_blk * att[:, :, None]                   # channel rescale


# ---------------------------------------------------------------------------
# Two-phase tiled path (per-sample slab does not fit VMEM):
#   pass 1: HW-tiled GAP accumulation + FC + sigmoid -> att (B, 1, C)
#   pass 2: HW-tiled rescale x * att
# ---------------------------------------------------------------------------
def _gap_fc_kernel(x_ref, w1_ref, b1_ref, w2_ref, b2_ref, att_ref, acc_ref,
                   *, hw, thw, inv_hw, need_mask):
    h_idx = pl.program_id(1)

    @pl.when(h_idx == 0)
    def _init():
        acc_ref[...] = jnp.zeros_like(acc_ref)

    x_blk = x_ref[...]                                     # (1, C, Thw)
    if need_mask:
        # Last HW tile extends past the array extent: zero the stale lanes
        # before accumulating so garbage never leaks into the mean.
        lane = lax.broadcasted_iota(jnp.int32, x_blk.shape, 2)
        x_blk = jnp.where(lane + h_idx * thw < hw, x_blk, 0.0)
    acc_ref[...] += jnp.sum(x_blk, axis=-1)                # (1, C)

    @pl.when(h_idx == pl.num_programs(1) - 1)
    def _finalize():
        gap = acc_ref[...] * inv_hw                        # (1, C)
        h = jnp.dot(gap, w1_ref[...], preferred_element_type=jnp.float32) + b1_ref[...]
        h = jnp.maximum(h, 0.0)
        a = jnp.dot(h, w2_ref[...], preferred_element_type=jnp.float32) + b2_ref[...]
        att_ref[...] = jax.nn.sigmoid(a)[None]             # (1, 1, C)


def _rescale_kernel(x_ref, att_ref, o_ref):
    att = att_ref[0]                                       # (1, C)
    # OOB tail of the last HW tile is computed but clamped away on writeback.
    o_ref[...] = x_ref[...] * att[:, :, None]


# ---------------------------------------------------------------------------
# Wrapper
# ---------------------------------------------------------------------------
def attention_block(x_nchw, w1, b1, w2, b2, *,
                    force_two_pass=False, hw_tile_override=None):
    """Forward pass of AttentionBlock.

    x_nchw : (B, C, H, W) float32
    w1, w2 : (C, C)  PyTorch nn.Linear weights (out_features, in_features)
    b1, b2 : (C,)    biases
    force_two_pass / hw_tile_override : test hooks for the tiled fallback path.
    returns (B, C, H, W) float32
    """
    B, C, H, W = x_nchw.shape
    HW = H * W
    x = x_nchw.reshape(B, C, HW)          # spatial = lane axis, no HBM padding

    # Pre-transpose so the kernel computes gap @ W == gap @ weight.T (PyTorch).
    w1_t = w1.T
    w2_t = w2.T
    b1_2d = b1.reshape(1, C)
    b2_2d = b2.reshape(1, C)
    inv_hw = 1.0 / float(HW)

    param_bytes = 2 * C * C * _F32 + 2 * C * _F32

    # ---- generation-aware VMEM request (v7x: 64 MiB phys, v5e/v6e: 128) ----
    vmem_cap = _vmem_capacity_bytes()
    vmem_limit = int(max(16 << 20, min(vmem_cap - (12 << 20), 100 << 20)))
    # Budget for the double-buffered in/out slabs (params double-buffered too).
    slab_budget = vmem_limit - 2 * param_bytes - (4 << 20)
    slab_budget = max(slab_budget, 4 * C * 128 * _F32)

    per_batch_bytes = C * HW * _F32
    bt_max = slab_budget // (4 * per_batch_bytes)          # in+out, 2x buffered

    if bt_max >= 1 and not force_two_pass:
        # ------------------- fused single-pass fast path -------------------
        bt = _largest_divisor_leq(B, bt_max)
        cost = pl.CostEstimate(
            flops=4 * B * C * C + 3 * B * C * HW,          # 2 matmuls + pool/rescale
            transcendentals=B * C,                          # sigmoid
            bytes_accessed=2 * B * C * HW * _F32 + param_bytes,
        )
        out = pl.pallas_call(
            functools.partial(_fused_kernel, inv_hw=inv_hw),
            out_shape=jax.ShapeDtypeStruct((B, C, HW), jnp.float32),
            grid=(B // bt,),
            in_specs=[
                pl.BlockSpec((bt, C, HW), lambda i: (i, 0, 0)),  # x: Bt batches/step
                pl.BlockSpec((C, C), lambda i: (0, 0)),          # w1: resident
                pl.BlockSpec((1, C), lambda i: (0, 0)),          # b1: resident
                pl.BlockSpec((C, C), lambda i: (0, 0)),          # w2: resident
                pl.BlockSpec((1, C), lambda i: (0, 0)),          # b2: resident
            ],
            out_specs=pl.BlockSpec((bt, C, HW), lambda i: (i, 0, 0)),
            compiler_params=pltpu.CompilerParams(
                dimension_semantics=("parallel",),               # megacore on v7x
                vmem_limit_bytes=vmem_limit,
            ),
            cost_estimate=cost,
        )(x, w1_t, b1_2d, w2_t, b2_2d)
        return out.reshape(B, C, H, W)

    # ----------------------- two-phase tiled path -----------------------
    thw = (slab_budget // (4 * C * _F32)) // 128 * 128
    if hw_tile_override is not None:
        thw = int(hw_tile_override)
    thw = max(128, min(thw, max(128, (HW // 128) * 128)))
    n_hw = pl.cdiv(HW, thw)
    need_mask = (HW % thw) != 0

    att = pl.pallas_call(
        functools.partial(_gap_fc_kernel, hw=HW, thw=thw, inv_hw=inv_hw,
                          need_mask=need_mask),
        out_shape=jax.ShapeDtypeStruct((B, 1, C), jnp.float32),
        grid=(B, n_hw),
        in_specs=[
            pl.BlockSpec((1, C, thw), lambda b, h: (b, 0, h)),
            pl.BlockSpec((C, C), lambda b, h: (0, 0)),
            pl.BlockSpec((1, C), lambda b, h: (0, 0)),
            pl.BlockSpec((C, C), lambda b, h: (0, 0)),
            pl.BlockSpec((1, C), lambda b, h: (0, 0)),
        ],
        out_specs=pl.BlockSpec((1, 1, C), lambda b, h: (b, 0, 0)),
        scratch_shapes=[pltpu.VMEM((1, C), jnp.float32)],     # GAP accumulator
        compiler_params=pltpu.CompilerParams(
            dimension_semantics=("parallel", "arbitrary"),
            vmem_limit_bytes=vmem_limit,
        ),
    )(x, w1_t, b1_2d, w2_t, b2_2d)

    out = pl.pallas_call(
        _rescale_kernel,
        out_shape=jax.ShapeDtypeStruct((B, C, HW), jnp.float32),
        grid=(B, n_hw),
        in_specs=[
            pl.BlockSpec((1, C, thw), lambda b, h: (b, 0, h)),
            pl.BlockSpec((1, 1, C), lambda b, h: (b, 0, 0)),
        ],
        out_specs=pl.BlockSpec((1, C, thw), lambda b, h: (b, 0, h)),
        compiler_params=pltpu.CompilerParams(
            dimension_semantics=("parallel", "arbitrary"),
            vmem_limit_bytes=vmem_limit,
        ),
    )(x, att)
    return out.reshape(B, C, H, W)


def _reference(x_nchw, w1, b1, w2, b2):
    """Pure-JAX reference matching the PyTorch forward."""
    gap = jnp.mean(x_nchw, axis=(2, 3))                    # (B, C)
    h = jnp.maximum(gap @ w1.T + b1, 0.0)
    att = jax.nn.sigmoid(h @ w2.T + b2)
    return x_nchw * att[:, :, None, None]


if __name__ == "__main__":
    key = jax.random.PRNGKey(0)
    kx, kw1, kb1, kw2, kb2, kx2 = jax.random.split(key, 6)

    B, C, H, W = 2, 4, 16, 16
    x = jax.random.normal(kx, (B, C, H, W), dtype=jnp.float32)
    w1 = jax.random.normal(kw1, (C, C), dtype=jnp.float32) * 0.1
    b1 = jax.random.normal(kb1, (C,), dtype=jnp.float32) * 0.1
    w2 = jax.random.normal(kw2, (C, C), dtype=jnp.float32) * 0.1
    b2 = jax.random.normal(kb2, (C,), dtype=jnp.float32) * 0.1

    # 1) Fused single-pass fast path (the path small/medium slabs take).
    y = jax.block_until_ready(attention_block(x, w1, b1, w2, b2))
    y_ref = _reference(x, w1, b1, w2, b2)
    assert y.shape == (B, C, H, W)
    assert jnp.allclose(y, y_ref, atol=1e-5, rtol=1e-5), "fast path mismatch"

    # 2) Two-phase tiled path (taken when a slab exceeds VMEM), forced here
    #    with a small HW tile so the accumulation loop is exercised.
    y2 = jax.block_until_ready(
        attention_block(x, w1, b1, w2, b2, force_two_pass=True, hw_tile_override=128))
    assert jnp.allclose(y2, y_ref, atol=1e-5, rtol=1e-5), "two-pass mismatch"

    # 3) Spatial size that is NOT a multiple of 128 (no pad/slice round trip),
    #    on both paths (two-pass additionally exercises the tail-lane mask).
    Hb, Wb = 16, 15
    xb = jax.random.normal(kx2, (B, C, Hb, Wb), dtype=jnp.float32)
    yb_ref = _reference(xb, w1, b1, w2, b2)
    yb = jax.block_until_ready(attention_block(xb, w1, b1, w2, b2))
    assert jnp.allclose(yb, yb_ref, atol=1e-5, rtol=1e-5), "unaligned fast path mismatch"
    yb2 = jax.block_until_ready(
        attention_block(xb, w1, b1, w2, b2, force_two_pass=True, hw_tile_override=128))
    assert jnp.allclose(yb2, yb_ref, atol=1e-5, rtol=1e-5), "unaligned two-pass mismatch"

    print("KERNEL_OK")
</pallas_src>

<mosaic_0001>
module attributes {stable_mosaic.version = 11 : i64} {
  func.func @_fused_kernel(%arg0: i32, %arg1: memref<2x4x256xf32, #tpu.memory_space<vmem>>, %arg2: memref<4x4xf32, #tpu.memory_space<vmem>>, %arg3: memref<1x4xf32, #tpu.memory_space<vmem>>, %arg4: memref<4x4xf32, #tpu.memory_space<vmem>>, %arg5: memref<1x4xf32, #tpu.memory_space<vmem>>, %arg6: memref<2x4x256xf32, #tpu.memory_space<vmem>>) attributes {dimension_semantics = [#tpu.dimension_semantics<parallel>], iteration_bounds = array<i64: 1>, scalar_prefetch = 0 : i64, scratch_operands = 0 : i64, tpu.core_type = #tpu.core_type<tc>, window_params = [{transform_indices = @transform_0, window_bounds = array<i64: 2, 4, 256>}, {pipeline_mode = #tpu.pipeline_mode<synchronous>, transform_indices = @transform_1, window_bounds = array<i64: 4, 4>}, {pipeline_mode = #tpu.pipeline_mode<synchronous>, transform_indices = @transform_2, window_bounds = array<i64: 1, 4>}, {pipeline_mode = #tpu.pipeline_mode<synchronous>, transform_indices = @transform_3, window_bounds = array<i64: 4, 4>}, {pipeline_mode = #tpu.pipeline_mode<synchronous>, transform_indices = @transform_4, window_bounds = array<i64: 1, 4>}, {transform_indices = @transform_5, window_bounds = array<i64: 2, 4, 256>}]} {
    %c0 = arith.constant 0 : index
    %c0_0 = arith.constant 0 : index
    %c0_1 = arith.constant 0 : index
    %0 = vector.load %arg1[%c0, %c0_0, %c0_1] : memref<2x4x256xf32, #tpu.memory_space<vmem>>, vector<2x4x256xf32>
    %cst = arith.constant dense<0.000000e+00> : vector<2x4xf32>
    %1 = vector.multi_reduction <add>, %0, %cst [2] : vector<2x4x256xf32> to vector<2x4xf32>
    %cst_2 = arith.constant 3.906250e-03 : f32
    %2 = vector.broadcast %cst_2 : f32 to vector<2x4xf32>
    %3 = arith.mulf %1, %2 : vector<2x4xf32>
    %c0_3 = arith.constant 0 : index
    %c0_4 = arith.constant 0 : index
    %4 = vector.load %arg2[%c0_3, %c0_4] : memref<4x4xf32, #tpu.memory_space<vmem>>, vector<4x4xf32>
    %cst_5 = arith.constant dense<0.000000e+00> : vector<2x4xf32>
    %5 = tpu.matmul %3, %4, %cst_5 {dimension_numbers = #tpu.dot_dimension_numbers<[1], [0], [0], [1], [0, 0, 1, 1], [], []>} : vector<2x4xf32>, vector<4x4xf32>, vector<2x4xf32> -> vector<2x4xf32>
    %c0_6 = arith.constant 0 : index
    %c0_7 = arith.constant 0 : index
    %6 = vector.load %arg3[%c0_6, %c0_7] : memref<1x4xf32, #tpu.memory_space<vmem>>, vector<1x4xf32>
    %7 = vector.broadcast %6 : vector<1x4xf32> to vector<2x4xf32>
    %8 = arith.addf %5, %7 : vector<2x4xf32>
    %cst_8 = arith.constant 0.000000e+00 : f32
    %9 = vector.broadcast %cst_8 : f32 to vector<2x4xf32>
    %10 = arith.maximumf %8, %9 : vector<2x4xf32>
    %c0_9 = arith.constant 0 : index
    %c0_10 = arith.constant 0 : index
    %11 = vector.load %arg4[%c0_9, %c0_10] : memref<4x4xf32, #tpu.memory_space<vmem>>, vector<4x4xf32>
    %cst_11 = arith.constant dense<0.000000e+00> : vector<2x4xf32>
    %12 = tpu.matmul %10, %11, %cst_11 {dimension_numbers = #tpu.dot_dimension_numbers<[1], [0], [0], [1], [0, 0, 1, 1], [], []>} : vector<2x4xf32>, vector<4x4xf32>, vector<2x4xf32> -> vector<2x4xf32>
    %c0_12 = arith.constant 0 : index
    %c0_13 = arith.constant 0 : index
    %13 = vector.load %arg5[%c0_12, %c0_13] : memref<1x4xf32, #tpu.memory_space<vmem>>, vector<1x4xf32>
    %14 = vector.broadcast %13 : vector<1x4xf32> to vector<2x4xf32>
    %15 = arith.addf %12, %14 : vector<2x4xf32>
    %16 = arith.negf %15 : vector<2x4xf32>
    %17 = math.exp %16 : vector<2x4xf32>
    %cst_14 = arith.constant 1.000000e+00 : f32
    %18 = vector.broadcast %cst_14 : f32 to vector<2x4xf32>
    %19 = arith.addf %18, %17 : vector<2x4xf32>
    %20 = arith.divf %18, %19 : vector<2x4xf32>
    %21 = vector.shape_cast %20 : vector<2x4xf32> to vector<2x4x1xf32>
    %22 = vector.broadcast %21 : vector<2x4x1xf32> to vector<2x4x256xf32>
    %23 = arith.mulf %0, %22 : vector<2x4x256xf32>
    %c0_15 = arith.constant 0 : index
    %c0_16 = arith.constant 0 : index
    %c0_17 = arith.constant 0 : index
    %24 = vector.load %arg6[%c0_15, %c0_16, %c0_17] : memref<2x4x256xf32, #tpu.memory_space<vmem>>, vector<2x4x256xf32>
    tpu.vector_store %arg6[%c0_15, %c0_16, %c0_17], %23 {strides = array<i32>} : memref<2x4x256xf32, #tpu.memory_space<vmem>>, vector<2x4x256xf32>,
    return
  }
  func.func @transform_0(%arg0: i32) -> (i32, i32, i32) {
    %c0_i32 = arith.constant 0 : i32
    %c0_i32_0 = arith.constant 0 : i32
    %c0_i32_1 = arith.constant 0 : i32
    return %arg0, %c0_i32, %c0_i32_0 : i32, i32, i32
  }
  func.func @transform_1(%arg0: i32) -> (i32, i32) {
    %c0_i32 = arith.constant 0 : i32
    %c0_i32_0 = arith.constant 0 : i32
    %c0_i32_1 = arith.constant 0 : i32
    return %c0_i32, %c0_i32_0 : i32, i32
  }
  func.func @transform_2(%arg0: i32) -> (i32, i32) {
    %c0_i32 = arith.constant 0 : i32
    %c0_i32_0 = arith.constant 0 : i32
    %c0_i32_1 = arith.constant 0 : i32
    return %c0_i32, %c0_i32_0 : i32, i32
  }
  func.func @transform_3(%arg0: i32) -> (i32, i32) {
    %c0_i32 = arith.constant 0 : i32
    %c0_i32_0 = arith.constant 0 : i32
    %c0_i32_1 = arith.constant 0 : i32
    return %c0_i32, %c0_i32_0 : i32, i32
  }
  func.func @transform_4(%arg0: i32) -> (i32, i32) {
    %c0_i32 = arith.constant 0 : i32
    %c0_i32_0 = arith.constant 0 : i32
    %c0_i32_1 = arith.constant 0 : i32
    return %c0_i32, %c0_i32_0 : i32, i32
  }
  func.func @transform_5(%arg0: i32) -> (i32, i32, i32) {
    %c0_i32 = arith.constant 0 : i32
    %c0_i32_0 = arith.constant 0 : i32
    %c0_i32_1 = arith.constant 0 : i32
    return %arg0, %c0_i32, %c0_i32_0 : i32, i32, i32
  }
}

</mosaic_0001>

<bundles_post_ra>
// kernel: tpu_custom_call.1
= control target key start
LH: loop header
LB: loop body
LE: loop exit
PB: predicated region body
PF: predicated region fallthrough
CT: control target
= control target key end

     0   :  { %10 = vsyncpa [#allocation3], 0  ;;  %s525_s0 = inlined_call_operand.hbm [shape: f32[2,4,256], index: 0, kind: input, shape index: {}]   ;;  %s526_s1 = inlined_call_operand.hbm [shape: f32[4,4], index: 1, kind: input, shape index: {}]   ;;  %s527_s2 = inlined_call_operand.vmem [shape: f32[1,4], index: 2, kind: input, shape index: {}]   ;;  %s528_s3 = inlined_call_operand.vmem [shape: f32[4,4], index: 3, kind: input, shape index: {}]   ;;  %s529_s4 = inlined_call_operand.vmem [shape: f32[1,4], index: 4, kind: input, shape index: {}]   ;;  %s530_s5 = inlined_call_operand.hbm [shape: f32[2,4,256], index: 5, kind: output, shape index: {}]  }
   0x1   :  { %11 = vsyncpa [#allocation6], 0 }
   0x2   :  { %12 = vsyncpa [#allocation4], 0  ;;  %s418_s18 = smov [#allocation2]   ;;  %s346_s22 = scalar_lea.hbm %s525_s0, 256 }
   0x3   :  { %s18_s19 = sshll.u32 %s418_s18, 4  ;;  %p347_p0 = scmp.ne.s32.totalorder %s525_s0, %s346_s22  ;;  %s19_s19 = int_to_ptr.vmem [resolvable:$true] %s18_s19 }
   0x4   :  { %p350_p1 = scmp.lt.u32.totalorder %s346_s22, %s525_s0 }
   0x6   :  { %p352_p2 = pnand %p350_p1, %p347_p0 }
   0x8   :  { %355 = shalt.err (!%p352_p2)
}
   0x9   :  { %s356_s27 = scalar_lea.vmem %s19_s19, 256  ;;  %p361_p4 = scmp.lt.s32.totalorder %s19_s19, %s19_s19 }
   0xa   :  { %p357_p3 = scmp.ne.s32.totalorder %s19_s19, %s356_s27  ;;  %p362_p5 = scmp.lt.s32.totalorder %s356_s27, %s356_s27 }
   0xc   :  { %p363_p6 = por %p362_p5, %p361_p4 }
   0xe   :  { %p364_p7 = pnand %p363_p6, %p357_p3 }
  0x10   :  { %367 = shalt.err (!%p364_p7)
}
  0x11   :  { %s419_s28 = smov 128   ;;  %s420_s29 = smov 8  }
  0x12   :  { %24 = dma.hbm_to_vmem [thread:$0]  %s525_s0, 256, %s19_s19, [#allocation3], %s419_s28, %s419_s28, %s420_s29  }
  0x13   :  { %s421_s7 = smov [#allocation5]   ;;  %s368_s11 = scalar_lea.hbm %s526_s1, 64 }
  0x14   :  { %s31_s8 = sshll.u32 %s421_s7, 4  ;;  %p369_p8 = scmp.ne.s32.totalorder %s526_s1, %s368_s11  ;;  %s32_s8 = int_to_ptr.vmem [resolvable:$true] %s31_s8 }
  0x15   :  { %p372_p9 = scmp.lt.u32.totalorder %s368_s11, %s526_s1 }
  0x17   :  { %p374_p10 = pnand %p372_p9, %p369_p8 }
  0x19   :  { %377 = shalt.err (!%p374_p10)
}
  0x1a   :  { %s378_s16 = scalar_lea.vmem %s32_s8, 64  ;;  %p383_p12 = scmp.lt.s32.totalorder %s32_s8, %s32_s8 }
  0x1b   :  { %p379_p11 = scmp.ne.s32.totalorder %s32_s8, %s378_s16  ;;  %p384_p13 = scmp.lt.s32.totalorder %s378_s16, %s378_s16 }
  0x1d   :  { %p385_p0 = por %p384_p13, %p383_p12 }
  0x1f   :  { %p386_p1 = pnand %p385_p0, %p379_p11 }
  0x21   :  { %389 = shalt.err (!%p386_p1)
}
  0x22   :  { %34 = dma.hbm_to_vmem [thread:$0]  %s526_s1, 64, %s32_s8, [#allocation6]  }
  0x23   :  { %412 = dma.done.wait [#allocation3], 256  }
  0x24   :  { %413 = vsyncadd [#allocation3], 4294967040 }
  0x25   :  { %414 = dma.done.wait [#allocation6], 64  }
  0x26   :  { %415 = vsyncadd [#allocation6], 4294967232  ;;  %vm55_vm0 = vcmask 1043456   ;;  %v483_v0 = vld [vmem:[#allocation2] sm:$0xff]  ;;  %v485_v1 = vld [vmem:[#allocation2 + $0x8] sm:$0xff]  ;;  %v422_v11 = vmov 0.0   ;;  %v78_v12 = vlaneseq }
  0x27   :  { %v51_v2 = vcombine.high %v483_v0, %v483_v0  ;;  %v56_v3 = vsel %vm55_vm0, %v483_v0, 0.0  ;;  %v52_v4 = vcombine.high %v485_v1, %v485_v1  ;;  %v61_v6 = vsel %vm55_vm0, %v485_v1, 0.0  ;;  %v68_v10 = vld [vmem:[#allocation5] sm:$0xf]  ;;  %322 = vmatprep.subr.mxu0 %v422_v11  ;;  %327 = vmatprep.subr.mxu1 %v422_v11  ;;  %v167_v23 = vld [vmem:[%s528_s3] sm:$0xf] }
  0x28   :  { %vm423_vm1 = vmmov 0   ;;  %323 = vmatpush3.msk.msra.mxu0 %vm55_vm0, %v68_v10  ;;  %v79_v13 = vand.u32 127, %v78_v12  ;;  %v81_v14 = vshrl.u32 %v78_v12, 7  ;;  %vm88_vm2 = vcmask 1041409   ;;  %328 = vmatpush3.msk.msra.mxu1 %vm55_vm0, %v167_v23  ;;  %v311_v24 = vld [vmem:[%s527_s2] ss:$0 sm:$0xff] }
  0x29   :  { %v57_v5 = vsel %vm55_vm0, %v51_v2, 0.0  ;;  %v62_v7 = vsel %vm55_vm0, %v52_v4, 0.0  ;;  %324 = vmatprep.mubr.msk.f32.mxu0 %vm423_vm1, %v422_v11  ;;  %329 = vmatprep.mubr.msk.f32.mxu1 %vm423_vm1, %v422_v11  ;;  %vm90_vm3 = vcmask 31744   ;;  %v314_v29 = vld [vmem:[%s529_s4] ss:$0 sm:$0xff]  ;;  %s425_s2 = smov [#allocation7]  }
  0x2a   :  { %v58_v8 = vadd.f32 %v57_v5, %v56_v3  ;;  %v63_v9 = vadd.f32 %v62_v7, %v61_v6  ;;  %v82_v16 = vsub.s32 %v79_v13, %v81_v14  ;;  %v259_v36 = vsub.s32 0, %v81_v14  ;;  %s298_s3 = sshll.u32 %s425_s2, 4  ;;  %s299_s3 = int_to_ptr.vmem [resolvable:$true] %s298_s3 }
  0x2b   :  { %v266_v39 = vsub.s32 1, %v81_v14  ;;  %v424_v41 = vmov 839922192   ;;  %s390_s4 = scalar_lea.vmem %s299_s3, 256  ;;  %p395_p3 = scmp.lt.s32.totalorder %s299_s3, %s299_s3 }
  0x2c   :  { %59 = vadd.xlane.f32.xlu0 %v58_v8  ;;  %v274_v42 = vunpack.c.l.s4 %v424_v41  ;;  %p391_p2 = scmp.ne.s32.totalorder %s299_s3, %s390_s4  ;;  %p396_p4 = scmp.lt.s32.totalorder %s390_s4, %s390_s4 }
  0x2e   :  { %v275_v43 = vunpack.c.0.s8 %v274_v42  ;;  %p397_p5 = por %p396_p4, %p395_p3 }
  0x30   :  { %64 = vadd.xlane.f32.xlu0 %v63_v9  ;;  %v278_v44 = vsub.s32 %v275_v43, %v81_v14  ;;  %p398_p6 = pnand %p397_p5, %p391_p2 }
  0xb9   :  { %v60_v15 = vpop.xlane.xlu0 %59 }
  0xba   :  { %v66_v17 = vmul.f32 0.00390625, %v60_v15 }
  0xbc   :  { %v83_v20 = vrot.slane %v66_v17, %v82_v16 }
  0xbd   :  { %v65_v18 = vpop.xlane.xlu0 %64 }
  0xbe   :  { %v67_v19 = vmul.f32 0.00390625, %v65_v18 }
  0xc0   :  { %v87_v21 = vrot.slane %v67_v19, %v82_v16 }
  0xc2   :  { %v89_v22 = vsel %vm88_vm2, %v87_v21, %v83_v20 }
  0xc3   :  { %325 = vmatmul.mubr.msk.f32.vlgmr.msra.gmra.mrb[0].mxu0 %vm90_vm3, %v89_v22 }
 0x196   :  { %v162_v25 = vpop.f32.mrb[0].mxu0 }
 0x197   :  { %v163_v26 = vadd.f32 %v311_v24, %v162_v25  ;;  %v326_v27 = vpop.f32.mrb[1].mxu0 }
 0x199   :  { %v166_v28 = vmax.f32 %v163_v26, 0.0 }
 0x19b   :  { %330 = vmatmul.mubr.msk.f32.vlgmr.msra.gmra.mrb[0].mxu1 %vm90_vm3, %v166_v28 }
 0x26e   :  { %v247_v30 = vpop.f32.mrb[0].mxu1 }
 0x26f   :  { %v248_v31 = vadd.f32 %v314_v29, %v247_v30  ;;  %v331_v32 = vpop.f32.mrb[1].mxu1 }
 0x271   :  { %v317_v33 = vmul.f32 -1.442695, %v248_v31 }
 0x273   :  { %342 = vpow2.f32 %v317_v33 }
 0x27d   :  { %v343_v34 = vpop.eup %342 }
 0x27e   :  { %v254_v35 = vadd.f32 1.0, %v343_v34 }
 0x280   :  { %344 = vrcp.f32 %v254_v35 }
 0x28a   :  { %v345_v37 = vpop.eup %344 }
 0x28b   :  { %v260_v38 = vrot.slane %v345_v37, %v259_v36  ;;  %v267_v40 = vrot.slane %v345_v37, %v266_v39 }
 0x28d   :  { %262 = vbcast.lane.b32.xlu1 %v260_v38, 256 }
 0x291   :  { %269 = vbcast.lane.b32.xlu1 %v267_v40, 256 }
 0x2ff   :  { %v263_v45 = vpop.permute.xlu1 %262 }
 0x300   :  { %v279_v46 = vrot.slane %v263_v45, %v278_v44 }
 0x302   :  { %v289_v47 = vmul.f32 %v279_v46, %v483_v0 }
 0x303   :  { %v270_v48 = vpop.permute.xlu1 %269 }
 0x304   :  { %291 = vst [vmem:[#allocation7] sm:$0xff] %v289_v47  ;;  %v286_v49 = vrot.slane %v270_v48, %v278_v44 }
 0x306   :  { %v290_v50 = vmul.f32 %v286_v49, %v485_v1 }
 0x308   :  { %292 = vst [vmem:[#allocation7 + $0x8] sm:$0xff] %v290_v50 }
 0x309   :  { %401 = shalt.err (!%p398_p6)
}
 0x30a   :  { %s402_s25 = scalar_lea.hbm %s530_s5, 256 }
 0x30b   :  { %p403_p7 = scmp.ne.s32.totalorder %s530_s5, %s402_s25  ;;  %p406_p8 = scmp.lt.u32.totalorder %s402_s25, %s530_s5 }
 0x30d   :  { %p408_p9 = pnand %p406_p8, %p403_p7 }
 0x30f   :  { %411 = shalt.err (!%p408_p9)
}
 0x310   :  { %304 = dma.vmem_to_hbm [thread:$0]  %s299_s3, 256, %s530_s5, [#allocation4], %s419_s28, %s419_s28, %s420_s29  }
 0x311   :  { %416 = dma.done.wait [#allocation4], 256  }
 0x312   :  { %417 = vsyncadd [#allocation4], 4294967040 }
 0x313   :  { %308 = vsyncpa [#allocation3], 1 }
 0x314   :  { %309 = vsyncpa [#allocation6], 1 }
 0x315   :  { %310 = vsyncpa [#allocation4], 1 }

</bundles_post_ra>
